<compile_context>
chip_gen: v6e
topology: v6e:2x2x1
jax: 0.10.0
libtpu: 0.0.40
codegen_flags: <defaults>
</compile_context>

<pallas_src>
import jax
import jax.numpy as jnp
from jax.experimental import pallas as pl
from jax.experimental.pallas import tpu as pltpu

EMBEDDING_SIZE = 16                  # constants.embedding_size
FEAT = 2 * EMBEDDING_SIZE            # fc1 input/output width = 32
LANES = 128                          # TPU lane width
PACK = LANES // FEAT                 # 4 batch rows packed per lane row


def _round_up(n, m):
    return ((n + m - 1) // m) * m


def _discriminator_kernel(x_ref, w1_ref, b1_ref, w2_ref, b2_ref, o_ref):
    # x_ref:  (TB4, 128)  -- 4 batch rows packed along lanes
    # w1_ref: (128, 128)  -- block-diag of 4 copies of fc1 weight (in, out)
    # b1_ref: (1, 128)    -- fc1 bias tiled 4x
    # w2_ref: (128, 4)    -- block-diag of 4 copies of proj weight (in, 1)
    # b2_ref: (1,) SMEM   -- proj bias scalar
    # o_ref:  (TB4, 4)    -- 4 outputs per packed row
    x = x_ref[...]
    # fc1 + ReLU (MXU matmul, K=128; VPU bias+relu on dense lanes)
    h = jnp.dot(x, w1_ref[...], preferred_element_type=jnp.float32)
    h = jnp.maximum(h + b1_ref[...], 0.0)
    # proj (MXU matmul -> 4 lanes per packed row) + scalar bias from SMEM
    out = jnp.dot(h, w2_ref[...], preferred_element_type=jnp.float32)
    o_ref[...] = (out + b2_ref[0]).astype(o_ref.dtype)


def discriminator_forward(x, w1, b1, w2, b2, *, max_tile_rows=1024):
    """x: (B, 2E) f32. w1: (2E, 2E) [PyTorch (out,in) layout], b1: (2E,),
    w2: (1, 2E), b2: (1,).  Returns (B, 1) f32."""
    B, F = x.shape
    assert F == FEAT
    dtype = jnp.float32

    # ---- one-time weight packing (block-diagonal, (in, out) layout) ----
    w1_t = jnp.asarray(w1, dtype).T                    # (F, F)
    w2_t = jnp.asarray(w2, dtype).T                    # (F, 1)
    eye = jnp.eye(PACK, dtype=dtype)
    w1_block = jnp.kron(eye, w1_t)                     # (128, 128)
    w2_block = jnp.kron(eye, w2_t)                     # (128, 4)
    b1_tiled = jnp.tile(jnp.asarray(b1, dtype), PACK).reshape(1, LANES)
    b2_smem = jnp.asarray(b2, dtype).reshape(1)        # scalar -> SMEM

    # ---- pack batch: 4 rows per lane row, pad to a whole number of tiles ----
    b4 = pl.cdiv(B, PACK)                              # packed rows needed
    tb4 = min(max_tile_rows, _round_up(b4, 8))         # tile (multiple of 8)
    b4_pad = _round_up(b4, tb4)
    b_pad = b4_pad * PACK
    x_pad = jnp.zeros((b_pad, FEAT), dtype).at[:B].set(jnp.asarray(x, dtype))
    x_packed = x_pad.reshape(b4_pad, LANES)            # (B/4, 128)

    grid = (b4_pad // tb4,)

    out_packed = pl.pallas_call(
        _discriminator_kernel,
        out_shape=jax.ShapeDtypeStruct((b4_pad, PACK), dtype),
        grid=grid,
        in_specs=[
            # streamed over the batch (packed-row) axis
            pl.BlockSpec((tb4, LANES), lambda i: (i, 0)),
            # weights / bias: constant block index -> VMEM-resident, one DMA
            pl.BlockSpec((LANES, LANES), lambda i: (0, 0)),
            pl.BlockSpec((1, LANES), lambda i: (0, 0)),
            pl.BlockSpec((LANES, PACK), lambda i: (0, 0)),
            # tiny scalar bias in SMEM (no padded VMEM tile)
            pl.BlockSpec(memory_space=pltpu.MemorySpace.SMEM),
        ],
        out_specs=pl.BlockSpec((tb4, PACK), lambda i: (i, 0)),
        compiler_params=pltpu.CompilerParams(
            dimension_semantics=("parallel",)),   # shard batch across v7x TCs
    )(x_packed, w1_block, b1_tiled, w2_block, b2_smem)

    # unpack: (B/4, 4) row-major == (B, 1)
    return out_packed.reshape(b_pad, 1)[:B]


def _init_linear(key, out_features, in_features):
    """Deterministic init mimicking PyTorch nn.Linear default (uniform ±1/sqrt(fan_in))."""
    kw, kb = jax.random.split(key)
    bound = 1.0 / jnp.sqrt(in_features)
    w = jax.random.uniform(kw, (out_features, in_features),
                           minval=-bound, maxval=bound, dtype=jnp.float32)
    b = jax.random.uniform(kb, (out_features,),
                           minval=-bound, maxval=bound, dtype=jnp.float32)
    return w, b


if __name__ == "__main__":
    key = jax.random.PRNGKey(0)
    kx, k1, k2 = jax.random.split(key, 3)

    B = 8
    x = jax.random.normal(kx, (B, FEAT), dtype=jnp.float32)

    w1, b1 = _init_linear(k1, FEAT, FEAT)   # fc1: Linear(2E, 2E)
    w2, b2 = _init_linear(k2, 1, FEAT)      # proj: Linear(2E, 1)

    out = discriminator_forward(x, w1, b1, w2, b2)
    out = jax.block_until_ready(out)

    # Pure-JAX reference check.
    ref = jnp.maximum(x @ w1.T + b1, 0.0) @ w2.T + b2
    assert out.shape == (B, 1)
    assert jnp.allclose(out, ref, atol=1e-5, rtol=1e-5)

    print("KERNEL_OK")
</pallas_src>

<mosaic_0001>
module attributes {stable_mosaic.version = 11 : i64} {
  func.func @_discriminator_kernel(%arg0: i32, %arg1: memref<8x128xf32, #tpu.memory_space<vmem>>, %arg2: memref<128x128xf32, #tpu.memory_space<vmem>>, %arg3: memref<1x128xf32, #tpu.memory_space<vmem>>, %arg4: memref<128x4xf32, #tpu.memory_space<vmem>>, %arg5: memref<1xf32, #tpu.memory_space<smem>>, %arg6: memref<8x4xf32, #tpu.memory_space<vmem>>) attributes {dimension_semantics = [#tpu.dimension_semantics<parallel>], iteration_bounds = array<i64: 1>, scalar_prefetch = 0 : i64, scratch_operands = 0 : i64, tpu.core_type = #tpu.core_type<tc>, window_params = [{transform_indices = @transform_0, window_bounds = array<i64: 8, 128>}, {pipeline_mode = #tpu.pipeline_mode<synchronous>, transform_indices = @transform_1, window_bounds = array<i64: 128, 128>}, {pipeline_mode = #tpu.pipeline_mode<synchronous>, transform_indices = @transform_2, window_bounds = array<i64: 1, 128>}, {pipeline_mode = #tpu.pipeline_mode<synchronous>, transform_indices = @transform_3, window_bounds = array<i64: 128, 4>}, {transform_indices = @transform_4, window_bounds = array<i64: 1>}, {transform_indices = @transform_5, window_bounds = array<i64: 8, 4>}]} {
    %c0 = arith.constant 0 : index
    %c0_0 = arith.constant 0 : index
    %0 = vector.load %arg1[%c0, %c0_0] : memref<8x128xf32, #tpu.memory_space<vmem>>, vector<8x128xf32>
    %c0_1 = arith.constant 0 : index
    %c0_2 = arith.constant 0 : index
    %1 = vector.load %arg2[%c0_1, %c0_2] : memref<128x128xf32, #tpu.memory_space<vmem>>, vector<128x128xf32>
    %cst = arith.constant dense<0.000000e+00> : vector<8x128xf32>
    %2 = tpu.matmul %0, %1, %cst {dimension_numbers = #tpu.dot_dimension_numbers<[1], [0], [0], [1], [0, 0, 1, 1], [], []>} : vector<8x128xf32>, vector<128x128xf32>, vector<8x128xf32> -> vector<8x128xf32>
    %c0_3 = arith.constant 0 : index
    %c0_4 = arith.constant 0 : index
    %3 = vector.load %arg3[%c0_3, %c0_4] : memref<1x128xf32, #tpu.memory_space<vmem>>, vector<1x128xf32>
    %4 = vector.broadcast %3 : vector<1x128xf32> to vector<8x128xf32>
    %5 = arith.addf %2, %4 : vector<8x128xf32>
    %cst_5 = arith.constant 0.000000e+00 : f32
    %6 = vector.broadcast %cst_5 : f32 to vector<8x128xf32>
    %7 = arith.maximumf %5, %6 : vector<8x128xf32>
    %c0_6 = arith.constant 0 : index
    %c0_7 = arith.constant 0 : index
    %8 = vector.load %arg4[%c0_6, %c0_7] : memref<128x4xf32, #tpu.memory_space<vmem>>, vector<128x4xf32>
    %cst_8 = arith.constant dense<0.000000e+00> : vector<8x4xf32>
    %9 = tpu.matmul %7, %8, %cst_8 {dimension_numbers = #tpu.dot_dimension_numbers<[1], [0], [0], [1], [0, 0, 1, 1], [], []>} : vector<8x128xf32>, vector<128x4xf32>, vector<8x4xf32> -> vector<8x4xf32>
    %c0_9 = arith.constant 0 : index
    %10 = memref.load %arg5[%c0_9] : memref<1xf32, #tpu.memory_space<smem>>
    %11 = vector.broadcast %10 : f32 to vector<8x4xf32>
    %12 = arith.addf %9, %11 : vector<8x4xf32>
    %c0_10 = arith.constant 0 : index
    %c0_11 = arith.constant 0 : index
    %13 = vector.load %arg6[%c0_10, %c0_11] : memref<8x4xf32, #tpu.memory_space<vmem>>, vector<8x4xf32>
    tpu.vector_store %arg6[%c0_10, %c0_11], %12 {strides = array<i32>} : memref<8x4xf32, #tpu.memory_space<vmem>>, vector<8x4xf32>,
    return
  }
  func.func @transform_0(%arg0: i32) -> (i32, i32) {
    %c0_i32 = arith.constant 0 : i32
    %c0_i32_0 = arith.constant 0 : i32
    return %arg0, %c0_i32 : i32, i32
  }
  func.func @transform_1(%arg0: i32) -> (i32, i32) {
    %c0_i32 = arith.constant 0 : i32
    %c0_i32_0 = arith.constant 0 : i32
    %c0_i32_1 = arith.constant 0 : i32
    return %c0_i32, %c0_i32_0 : i32, i32
  }
  func.func @transform_2(%arg0: i32) -> (i32, i32) {
    %c0_i32 = arith.constant 0 : i32
    %c0_i32_0 = arith.constant 0 : i32
    %c0_i32_1 = arith.constant 0 : i32
    return %c0_i32, %c0_i32_0 : i32, i32
  }
  func.func @transform_3(%arg0: i32) -> (i32, i32) {
    %c0_i32 = arith.constant 0 : i32
    %c0_i32_0 = arith.constant 0 : i32
    %c0_i32_1 = arith.constant 0 : i32
    return %c0_i32, %c0_i32_0 : i32, i32
  }
  func.func @transform_4(%arg0: i32) -> i32 {
    %c0_i32 = arith.constant 0 : i32
    %c0_i32_0 = arith.constant 0 : i32
    return %c0_i32 : i32
  }
  func.func @transform_5(%arg0: i32) -> (i32, i32) {
    %c0_i32 = arith.constant 0 : i32
    %c0_i32_0 = arith.constant 0 : i32
    return %arg0, %c0_i32 : i32, i32
  }
}

</mosaic_0001>

<bundles_post_ra>
// kernel: tpu_custom_call.1
= control target key start
LH: loop header
LB: loop body
LE: loop exit
PB: predicated region body
PF: predicated region fallthrough
CT: control target
= control target key end

     0   :  { %11 = vsyncpa [#allocation4], 0  ;;  %s353_s18 = smov [#allocation3]   ;;  %s528_s0 = inlined_call_operand.hbm [shape: f32[8,128], index: 0, kind: input, shape index: {}]   ;;  %s529_s1 = inlined_call_operand.vmem [shape: f32[128,128], index: 1, kind: input, shape index: {}]   ;;  %s530_s2 = inlined_call_operand.vmem [shape: f32[1,128], index: 2, kind: input, shape index: {}]   ;;  %s531_s3 = inlined_call_operand.vmem [shape: f32[128,4], index: 3, kind: input, shape index: {}]   ;;  %s532_s4 = inlined_call_operand.<no memory space> [shape: f32[1], index: 4, kind: input, shape index: {}]   ;;  %s533_s5 = inlined_call_operand.vmem [shape: f32[8,4], index: 5, kind: output, shape index: {}]  }
   0x1   :  { %s18_s19 = sshll.u32 %s353_s18, 4  ;;  %s19_s19 = int_to_ptr.vmem [resolvable:$true] %s18_s19 }
   0x2   :  { %s339_s20 = scalar_lea.vmem %s19_s19, 128  ;;  %p344_p1 = scmp.lt.s32.totalorder %s19_s19, %s19_s19 }
   0x3   :  { %p340_p0 = scmp.ne.s32.totalorder %s19_s19, %s339_s20  ;;  %p345_p2 = scmp.lt.s32.totalorder %s339_s20, %s339_s20 }
   0x5   :  { %p346_p3 = por %p345_p2, %p344_p1 }
   0x7   :  { %p347_p4 = pnand %p346_p3, %p340_p0 }
   0x9   :  { %350 = shalt.err (!%p347_p4)
}
   0xa   :  { %21 = dma.hbm_to_vmem [thread:$0]  %s528_s0, 128, %s19_s19, [#allocation4]  }
   0xb   :  { %351 = dma.done.wait [#allocation4], 128  }
   0xc   :  { %352 = vsyncadd [#allocation4], 4294967168  ;;  %v354_v0 = vmov 0.0   ;;  %vm355_vm0 = vmmov 0   ;;  %v49_v1 = vld [vmem:[%s529_s1 + $0x78] sm:$0xff]  ;;  %v48_v2 = vld [vmem:[%s529_s1 + $0x70] sm:$0xff]  ;;  %v145_v39 = vstv %s532_s4 }
   0xd   :  { %258 = vmatprep.subr.mxu0 %v354_v0  ;;  %290 = vmatprep.mubr.msk.f32.mxu0 %vm355_vm0, %v354_v0  ;;  %v47_v3 = vld [vmem:[%s529_s1 + $0x68] sm:$0xff]  ;;  %v46_v4 = vld [vmem:[%s529_s1 + $0x60] sm:$0xff]  ;;  %v143_v5 = vld [vmem:[%s531_s3 + $0x78] sm:$0xff]  ;;  %vm216_vm1 = vcmask 31744  }
   0xe   :  { %293 = vmatprep.subr.mxu1 %v354_v0  ;;  %325 = vmatprep.mubr.msk.f32.mxu1 %vm355_vm0, %v354_v0  ;;  %v45_v6 = vld [vmem:[%s529_s1 + $0x58] sm:$0xff]  ;;  %v142_v7 = vld [vmem:[%s531_s3 + $0x70] sm:$0xff]  ;;  %v141_v8 = vld [vmem:[%s531_s3 + $0x68] sm:$0xff] }
   0xf   :  { %259 = vmatpush3.msra.mxu0 %v49_v1  ;;  %294 = vmatpush3.msra.mxu1 %v143_v5  ;;  %v44_v9 = vld [vmem:[%s529_s1 + $0x50] sm:$0xff]  ;;  %v140_v10 = vld [vmem:[%s531_s3 + $0x60] sm:$0xff]  ;;  %v43_v11 = vld [vmem:[%s529_s1 + $0x48] sm:$0xff] }
  0x10   :  { %260 = vmatprep.subr.mxu0 %v354_v0  ;;  %295 = vmatprep.subr.mxu1 %v354_v0  ;;  %v139_v12 = vld [vmem:[%s531_s3 + $0x58] sm:$0xff]  ;;  %v42_v13 = vld [vmem:[%s529_s1 + $0x40] sm:$0xff]  ;;  %v138_v14 = vld [vmem:[%s531_s3 + $0x50] sm:$0xff] }
  0x11   :  { %261 = vmatpush3.msra.mxu0 %v48_v2  ;;  %296 = vmatpush3.msra.mxu1 %v142_v7  ;;  %v41_v15 = vld [vmem:[%s529_s1 + $0x38] sm:$0xff]  ;;  %v137_v16 = vld [vmem:[%s531_s3 + $0x48] sm:$0xff]  ;;  %v40_v17 = vld [vmem:[%s529_s1 + $0x30] sm:$0xff] }
  0x12   :  { %262 = vmatprep.subr.mxu0 %v354_v0  ;;  %297 = vmatprep.subr.mxu1 %v354_v0  ;;  %v136_v18 = vld [vmem:[%s531_s3 + $0x40] sm:$0xff]  ;;  %v39_v19 = vld [vmem:[%s529_s1 + $0x28] sm:$0xff]  ;;  %v135_v20 = vld [vmem:[%s531_s3 + $0x38] sm:$0xff] }
  0x13   :  { %263 = vmatpush3.msra.mxu0 %v47_v3  ;;  %298 = vmatpush3.msra.mxu1 %v141_v8  ;;  %v38_v21 = vld [vmem:[%s529_s1 + $0x20] sm:$0xff]  ;;  %v134_v22 = vld [vmem:[%s531_s3 + $0x30] sm:$0xff]  ;;  %v37_v23 = vld [vmem:[%s529_s1 + $0x18] sm:$0xff] }
  0x14   :  { %264 = vmatprep.subr.mxu0 %v354_v0  ;;  %299 = vmatprep.subr.mxu1 %v354_v0  ;;  %v133_v24 = vld [vmem:[%s531_s3 + $0x28] sm:$0xff]  ;;  %v36_v25 = vld [vmem:[%s529_s1 + $0x10] sm:$0xff]  ;;  %v132_v26 = vld [vmem:[%s531_s3 + $0x20] sm:$0xff] }
  0x15   :  { %265 = vmatpush3.msra.mxu0 %v46_v4  ;;  %300 = vmatpush3.msra.mxu1 %v140_v10  ;;  %v35_v27 = vld [vmem:[%s529_s1 + $0x8] sm:$0xff]  ;;  %v131_v28 = vld [vmem:[%s531_s3 + $0x18] sm:$0xff]  ;;  %v34_v29 = vld [vmem:[%s529_s1] sm:$0xff] }
  0x16   :  { %266 = vmatprep.subr.mxu0 %v354_v0  ;;  %301 = vmatprep.subr.mxu1 %v354_v0  ;;  %v33_v30 = vld [vmem:[#allocation3] sm:$0xff]  ;;  %v130_v31 = vld [vmem:[%s531_s3 + $0x10] sm:$0xff]  ;;  %v129_v32 = vld [vmem:[%s531_s3 + $0x8] sm:$0xff] }
  0x17   :  { %267 = vmatpush3.msra.mxu0 %v45_v6  ;;  %302 = vmatpush3.msra.mxu1 %v139_v12  ;;  %v128_v33 = vld [vmem:[%s531_s3] sm:$0xff] }
  0x18   :  { %268 = vmatprep.subr.mxu0 %v354_v0  ;;  %303 = vmatprep.subr.mxu1 %v354_v0  ;;  %v223_v34 = vld [vmem:[%s530_s2] ss:$0 sm:$0xff] }
  0x19   :  { %269 = vmatpush3.msra.mxu0 %v44_v9  ;;  %304 = vmatpush3.msra.mxu1 %v138_v14 }
  0x1a   :  { %270 = vmatprep.subr.mxu0 %v354_v0  ;;  %305 = vmatprep.subr.mxu1 %v354_v0 }
  0x1b   :  { %271 = vmatpush3.msra.mxu0 %v43_v11  ;;  %306 = vmatpush3.msra.mxu1 %v137_v16 }
  0x1c   :  { %272 = vmatprep.subr.mxu0 %v354_v0  ;;  %307 = vmatprep.subr.mxu1 %v354_v0 }
  0x1d   :  { %273 = vmatpush3.msra.mxu0 %v42_v13  ;;  %308 = vmatpush3.msra.mxu1 %v136_v18 }
  0x1e   :  { %274 = vmatprep.subr.mxu0 %v354_v0  ;;  %309 = vmatprep.subr.mxu1 %v354_v0 }
  0x1f   :  { %275 = vmatpush3.msra.mxu0 %v41_v15  ;;  %310 = vmatpush3.msra.mxu1 %v135_v20 }
  0x20   :  { %276 = vmatprep.subr.mxu0 %v354_v0  ;;  %311 = vmatprep.subr.mxu1 %v354_v0 }
  0x21   :  { %277 = vmatpush3.msra.mxu0 %v40_v17  ;;  %312 = vmatpush3.msra.mxu1 %v134_v22 }
  0x22   :  { %278 = vmatprep.subr.mxu0 %v354_v0  ;;  %313 = vmatprep.subr.mxu1 %v354_v0 }
  0x23   :  { %279 = vmatpush3.msra.mxu0 %v39_v19  ;;  %314 = vmatpush3.msra.mxu1 %v133_v24 }
  0x24   :  { %280 = vmatprep.subr.mxu0 %v354_v0  ;;  %315 = vmatprep.subr.mxu1 %v354_v0 }
  0x25   :  { %281 = vmatpush3.msra.mxu0 %v38_v21  ;;  %316 = vmatpush3.msra.mxu1 %v132_v26 }
  0x26   :  { %282 = vmatprep.subr.mxu0 %v354_v0  ;;  %317 = vmatprep.subr.mxu1 %v354_v0 }
  0x27   :  { %283 = vmatpush3.msra.mxu0 %v37_v23  ;;  %318 = vmatpush3.msra.mxu1 %v131_v28 }
  0x28   :  { %284 = vmatprep.subr.mxu0 %v354_v0  ;;  %319 = vmatprep.subr.mxu1 %v354_v0 }
  0x29   :  { %285 = vmatpush3.msra.mxu0 %v36_v25  ;;  %320 = vmatpush3.msra.mxu1 %v130_v31 }
  0x2a   :  { %286 = vmatprep.subr.mxu0 %v354_v0  ;;  %321 = vmatprep.subr.mxu1 %v354_v0 }
  0x2b   :  { %287 = vmatpush3.msra.mxu0 %v35_v27  ;;  %322 = vmatpush3.msra.mxu1 %v129_v32 }
  0x2c   :  { %288 = vmatprep.subr.mxu0 %v354_v0  ;;  %323 = vmatprep.subr.mxu1 %v354_v0 }
  0x2d   :  { %289 = vmatpush3.msra.mxu0 %v34_v29  ;;  %324 = vmatpush3.msra.mxu1 %v128_v33 }
  0x2e   :  { %291 = vmatmul.mubr.f32.vlgmr.msra.gmra.mxu0 %v33_v30 }
  0xee   :  { %v123_v35 = vpop.f32.mrf.mxu0 }
  0xef   :  { %v124_v36 = vadd.f32 %v223_v34, %v123_v35 }
  0xf0   :  { %v292_v37 = vpop.f32.mrf.mxu0 }
  0xf1   :  { %v127_v38 = vmax.f32 %v124_v36, 0.0 }
  0xf3   :  { %326 = vmatmul.mubr.f32.vlgmr.msra.gmra.mxu1 %v127_v38 }
 0x1b3   :  { %v212_v40 = vpop.f32.mrf.mxu1 }
 0x1b4   :  { %v213_v41 = vadd.f32 %v212_v40, %v145_v39 }
 0x1b5   :  { %v327_v42 = vpop.f32.mrf.mxu1 }
 0x1b6   :  { %217 = vst.msk [vmem:[%s533_s5] sm:$0xff] %vm216_vm1, %v213_v41 }
 0x1b7   :  { %222 = vsyncpa [#allocation4], 1 }

</bundles_post_ra>
